<compile_context>
chip_gen: v5e
topology: v5e:2x2
jax: 0.10.0
libtpu: 0.0.40
codegen_flags: <defaults>
</compile_context>

<pallas_src>
import jax
import jax.numpy as jnp
from jax import lax
from jax.experimental import pallas as pl
from jax.experimental.pallas import tpu as pltpu

# --- deterministic "config" ------------------------------------------------
EVIDENTIAL_LAMBDA = 0.1      # config.TRAIN.EVIDENTIAL_LAMBDA
TEMPORAL_LOSS_WEIGHT = 0.5   # config.TRAIN.TEMPORAL_LOSS_WEIGHT
USE_UNCERTAINTY = True       # config.MODEL.USE_UNCERTAINTY
USE_BILEVEL = False          # config.TRAIN.USE_BILEVEL_CONSISTENCY

_VMEM_BUDGET_BYTES = 12 * 1024 * 1024   # < v5e's 16 MiB default scoped VMEM


def _round_up(x, m):
    return (x + m - 1) // m * m


def _softplus(x):
    # branch-free, numerically stable softplus: max(x,0) + log1p(exp(-|x|))
    return jnp.maximum(x, 0.0) + jnp.log1p(jnp.exp(-jnp.abs(x)))


def _bce_with_logits(x, y):
    # numerically stable BCEWithLogitsLoss, elementwise (mean taken in glue)
    return jnp.maximum(x, 0.0) - x * y + jnp.log1p(jnp.exp(-jnp.abs(x)))


def _divisors(n):
    ds, d = set(), 1
    while d * d <= n:
        if n % d == 0:
            ds.add(d)
            ds.add(n // d)
        d += 1
    return ds


def _pick_group(B, T):
    """Largest divisor g of B with g*T <= 128 (lane-dense free flatten)."""
    if T >= 128:
        return 1
    best = 1
    for g in _divisors(B):
        if g * T <= 128 and g > best:
            best = g
    return best


def _plane_bytes(rows, cols, itemsize):
    # VMEM tiles are padded to (8, 128) in their last two dims.
    return _round_up(max(rows, 1), 8) * _round_up(max(cols, 1), 128) * itemsize


def _block_vmem_bytes(rows, L, itemsizes):
    in_bytes = (_plane_bytes(rows, 2 * L, itemsizes[0])   # evidential (interleaved)
                + _plane_bytes(rows, L, itemsizes[1])     # refined
                + _plane_bytes(rows, L, itemsizes[2])     # raw
                + _plane_bytes(rows, L, itemsizes[3]))    # ground truth
    out_bytes = _plane_bytes(8, 128, 4)
    total = 2 * (in_bytes + out_bytes)                    # double-buffered pipeline
    total += 16 * _plane_bytes(rows, 2 * L, 4)            # f32 in-kernel temporaries
    total += 4 * _plane_bytes(L, 2 * L, 4)                # iota / expansion matrices
    return total


def _pick_row_tile(Bg, L, itemsizes, budget=_VMEM_BUDGET_BYTES):
    """Largest row tile that divides Bg, is a multiple of 8 (or the full
    extent), and whose *padded* VMEM working set fits the budget."""
    cands = sorted((d for d in _divisors(Bg) if d == Bg or d % 8 == 0),
                   reverse=True)
    for t in cands:
        if _block_vmem_bytes(t, L, itemsizes) <= budget:
            return t
    # TODO(synk): extremely long rows (huge g*T) would additionally need lane
    # tiling (with a halo for the temporal diff); use the smallest legal tile.
    return cands[-1]


@jax.jit
def master_loss(evidential_output, refined_scores, raw_scores,
                ground_truth_relevance):
    """MasterLoss forward.  All layout glue is copy-free (row-major reshapes)."""
    B, T = refined_scores.shape[0], refined_scores.shape[1]

    g = _pick_group(B, T)          # lane-dense grouping factor (divides B)
    Bg, L = B // g, g * T

    # Free reshapes (contiguous): no transposes, no HBM copies.
    ev2 = evidential_output.reshape(Bg, 2 * L)   # interleaved [a0,b0,a1,b1,...]
    refined2 = refined_scores.reshape(Bg, L)
    raw2 = raw_scores.reshape(Bg, L)
    gt2 = ground_truth_relevance.reshape(Bg, L)

    itemsizes = (jnp.dtype(ev2.dtype).itemsize, jnp.dtype(refined2.dtype).itemsize,
                 jnp.dtype(raw2.dtype).itemsize, jnp.dtype(gt2.dtype).itemsize)
    tb = _pick_row_tile(Bg, L, itemsizes)
    num_tiles = Bg // tb

    has_temporal = (T > 1) and (TEMPORAL_LOSS_WEIGHT > 0.0) and (not USE_BILEVEL)
    lam = float(EVIDENTIAL_LAMBDA)

    def kernel(ev_ref, refined_ref, raw_ref, gt_ref, out_ref):
        y = gt_ref[...].astype(jnp.float32)            # (tb, L)
        raw = raw_ref[...].astype(jnp.float32)         # (tb, L)
        refined = refined_ref[...].astype(jnp.float32) # (tb, L)
        ev = ev_ref[...].astype(jnp.float32)           # (tb, 2L) interleaved

        # ---- loss_raw: BCEWithLogitsLoss(raw_scores.squeeze(-1), gt) ----
        primary_sum = jnp.sum(_bce_with_logits(raw, y))

        if USE_UNCERTAINTY:
            # ---- EvidentialLoss on the interleaved layout ----
            evd = _softplus(ev) + 1.0        # [alpha, beta, alpha, beta, ...]
            log_evd = jnp.log(evd)           # [log a, log b, ...]

            # Pair-expand labels onto the interleaved grid with the idle MXU:
            # w[:, 2i] = y_i, w[:, 2i+1] = 1 - y_i   (exact for {0,1} labels)
            r = lax.broadcasted_iota(jnp.int32, (L, 2 * L), 0)
            c = lax.broadcasted_iota(jnp.int32, (L, 2 * L), 1)
            expand = jnp.where(c == 2 * r, 1.0,
                               jnp.where(c == 2 * r + 1, -1.0, 0.0))
            lane2 = lax.broadcasted_iota(jnp.int32, ev.shape, 1)
            base = (lane2 % 2).astype(jnp.float32)     # 1 on beta lanes
            w = base + jnp.dot(y, expand.astype(jnp.float32),
                               preferred_element_type=jnp.float32)

            # sum_i [ y_i*log(alpha_i) + (1-y_i)*log(beta_i) ]
            weighted_log_sum = jnp.sum(w * log_evd)

            # per-pair quantities at even offsets j = 2i of length-(2L-1) slices
            left = evd[:, :-1]
            right = evd[:, 1:]
            S = left + right                 # alpha_i + beta_i at even j
            inv_S = pl.reciprocal(S)         # exact: feeds log(S)
            p_a = left * inv_S               # alpha_i / S_i at even j
            log_S = jnp.log(S)
            # (2 + alpha + beta) / S == 1 + 2/S
            kl = jnp.abs(w[:, :-1] - p_a) * (1.0 + 2.0 * inv_S)

            pj = lax.broadcasted_iota(jnp.int32, S.shape, 1)
            even = (pj % 2) == 0
            pair_sum = jnp.sum(jnp.where(even, log_S + lam * kl, 0.0))

            # sum_i [ logS_i - y_i*log(a_i) - (1-y_i)*log(b_i) + lam*kl_i ]
            primary_sum = primary_sum + (pair_sum - weighted_log_sum)
        else:
            primary_sum = primary_sum + jnp.sum(_bce_with_logits(refined, y))

        # ---- baseline temporal L1 smoothing on refined_scores ----
        if has_temporal:
            diff = refined[:, 1:] - refined[:, :-1]
            dj = lax.broadcasted_iota(jnp.int32, diff.shape, 1)
            valid = (dj % T) != (T - 1)      # drop diffs crossing original rows
            temporal_sum = jnp.sum(jnp.where(valid, jnp.abs(diff), 0.0))
        else:
            temporal_sum = 0.0

        # per-tile partial sums -> lane-dense (1, 8, 128) output block
        out_sub = lax.broadcasted_iota(jnp.int32, (1, 8, 128), 1)
        out_lane = lax.broadcasted_iota(jnp.int32, (1, 8, 128), 2)
        tile = jnp.where((out_sub == 0) & (out_lane == 0), primary_sum, 0.0)
        tile = jnp.where((out_sub == 0) & (out_lane == 1), temporal_sum, tile)
        out_ref[...] = tile

    parts = pl.pallas_call(
        kernel,
        out_shape=jax.ShapeDtypeStruct((num_tiles, 8, 128), jnp.float32),
        grid=(num_tiles,),
        in_specs=[
            pl.BlockSpec((tb, 2 * L), lambda i: (i, 0)),   # evidential (Bg, 2L)
            pl.BlockSpec((tb, L), lambda i: (i, 0)),       # refined    (Bg, L)
            pl.BlockSpec((tb, L), lambda i: (i, 0)),       # raw        (Bg, L)
            pl.BlockSpec((tb, L), lambda i: (i, 0)),       # gt         (Bg, L)
        ],
        out_specs=pl.BlockSpec((1, 8, 128), lambda i: (i, 0, 0)),
        compiler_params=pltpu.CompilerParams(
            dimension_semantics=("parallel",)),   # independent tiles (megacore OK)
    )(ev2, refined2, raw2, gt2)

    flat = parts.reshape(num_tiles, 8 * 128)
    primary_loss = jnp.sum(flat[:, 0]) * (1.0 / float(B * T))
    if has_temporal:
        temporal_loss = jnp.sum(flat[:, 1]) * (
            TEMPORAL_LOSS_WEIGHT / float(B * (T - 1)))
    else:
        temporal_loss = jnp.float32(0.0)
    total_loss = primary_loss + temporal_loss
    return total_loss, primary_loss, temporal_loss


if __name__ == "__main__":
    key = jax.random.PRNGKey(0)
    k1, k2, k3, k4 = jax.random.split(key, 4)

    B, T = 2, 8
    # model_outputs[0]: evidential head output (B, T, 2)
    evidential_output = jax.random.normal(k1, (B, T, 2), dtype=jnp.float32)
    # model_outputs[1]: refined scores (B, T, 1)
    refined_scores = jax.random.normal(k2, (B, T, 1), dtype=jnp.float32)
    # model_outputs[2]: raw scores (B, T, 1)
    raw_scores = jax.random.normal(k3, (B, T, 1), dtype=jnp.float32)
    # ground truth relevance labels (B, T) as integer {0,1}; cast to f32 in-kernel
    ground_truth = (jax.random.uniform(k4, (B, T)) > 0.5).astype(jnp.int32)

    total_loss, primary_loss, temporal_loss = master_loss(
        evidential_output, refined_scores, raw_scores, ground_truth
    )
    jax.block_until_ready((total_loss, primary_loss, temporal_loss))
    print("KERNEL_OK")
</pallas_src>

<mosaic_0001>
module attributes {stable_mosaic.version = 11 : i64} {
  func.func @kernel(%arg0: i32, %arg1: memref<1x32xf32, #tpu.memory_space<vmem>>, %arg2: memref<1x16xf32, #tpu.memory_space<vmem>>, %arg3: memref<1x16xf32, #tpu.memory_space<vmem>>, %arg4: memref<1x16xi32, #tpu.memory_space<vmem>>, %arg5: memref<1x8x128xf32, #tpu.memory_space<vmem>>) attributes {dimension_semantics = [#tpu.dimension_semantics<parallel>], iteration_bounds = array<i64: 1>, scalar_prefetch = 0 : i64, scratch_operands = 0 : i64, tpu.core_type = #tpu.core_type<tc>, window_params = [{transform_indices = @transform_0, window_bounds = array<i64: 1, 32>}, {transform_indices = @transform_1, window_bounds = array<i64: 1, 16>}, {transform_indices = @transform_2, window_bounds = array<i64: 1, 16>}, {transform_indices = @transform_3, window_bounds = array<i64: 1, 16>}, {transform_indices = @transform_4, window_bounds = array<i64: 1, 8, 128>}]} {
    %c0 = arith.constant 0 : index
    %c0_0 = arith.constant 0 : index
    %0 = vector.load %arg4[%c0, %c0_0] : memref<1x16xi32, #tpu.memory_space<vmem>>, vector<1x16xi32>
    %1 = arith.sitofp %0 : vector<1x16xi32> to vector<1x16xf32>
    %c0_1 = arith.constant 0 : index
    %c0_2 = arith.constant 0 : index
    %2 = vector.load %arg3[%c0_1, %c0_2] : memref<1x16xf32, #tpu.memory_space<vmem>>, vector<1x16xf32>
    %c0_3 = arith.constant 0 : index
    %c0_4 = arith.constant 0 : index
    %3 = vector.load %arg2[%c0_3, %c0_4] : memref<1x16xf32, #tpu.memory_space<vmem>>, vector<1x16xf32>
    %c0_5 = arith.constant 0 : index
    %c0_6 = arith.constant 0 : index
    %4 = vector.load %arg1[%c0_5, %c0_6] : memref<1x32xf32, #tpu.memory_space<vmem>>, vector<1x32xf32>
    %cst = arith.constant 0.000000e+00 : f32
    %5 = vector.broadcast %cst : f32 to vector<1x16xf32>
    %6 = arith.maximumf %2, %5 : vector<1x16xf32>
    %7 = arith.mulf %2, %1 : vector<1x16xf32>
    %8 = arith.subf %6, %7 : vector<1x16xf32>
    %9 = math.absf %2 : vector<1x16xf32>
    %cst_7 = arith.constant 0.000000e+00 : f32
    %10 = vector.broadcast %cst_7 : f32 to vector<1x16xf32>
    %11 = arith.subf %10, %9 : vector<1x16xf32>
    %12 = math.exp %11 : vector<1x16xf32>
    %13 = math.log1p %12 : vector<1x16xf32>
    %14 = arith.addf %8, %13 : vector<1x16xf32>
    %15 = vector.shape_cast %14 : vector<1x16xf32> to vector<1x1x16xf32>
    %cst_8 = arith.constant dense<0.000000e+00> : vector<1xf32>
    %16 = vector.multi_reduction <add>, %15, %cst_8 [1, 2] : vector<1x1x16xf32> to vector<1xf32>
    %17 = vector.shape_cast %16 : vector<1xf32> to vector<1x1x1xf32>
    %18 = vector.extract %17[0, 0, 0] : f32 from vector<1x1x1xf32>
    %cst_9 = arith.constant 0.000000e+00 : f32
    %19 = vector.broadcast %cst_9 : f32 to vector<1x32xf32>
    %20 = arith.maximumf %4, %19 : vector<1x32xf32>
    %21 = math.absf %4 : vector<1x32xf32>
    %cst_10 = arith.constant 0.000000e+00 : f32
    %22 = vector.broadcast %cst_10 : f32 to vector<1x32xf32>
    %23 = arith.subf %22, %21 : vector<1x32xf32>
    %24 = math.exp %23 : vector<1x32xf32>
    %25 = math.log1p %24 : vector<1x32xf32>
    %26 = arith.addf %20, %25 : vector<1x32xf32>
    %cst_11 = arith.constant 1.000000e+00 : f32
    %27 = vector.broadcast %cst_11 : f32 to vector<1x32xf32>
    %28 = arith.addf %26, %27 : vector<1x32xf32>
    %29 = math.log %28 : vector<1x32xf32>
    %30 = tpu.iota {dimensions = array<i32: 0>} : vector<16x32xi32>
    %31 = tpu.iota {dimensions = array<i32: 1>} : vector<16x32xi32>
    %c2_i32 = arith.constant 2 : i32
    %32 = vector.broadcast %c2_i32 : i32 to vector<16x32xi32>
    %33 = arith.muli %32, %30 : vector<16x32xi32>
    %34 = arith.cmpi eq, %31, %33 : vector<16x32xi32>
    %c2_i32_12 = arith.constant 2 : i32
    %35 = vector.broadcast %c2_i32_12 : i32 to vector<16x32xi32>
    %36 = arith.muli %35, %30 : vector<16x32xi32>
    %c1_i32 = arith.constant 1 : i32
    %37 = vector.broadcast %c1_i32 : i32 to vector<16x32xi32>
    %38 = arith.addi %36, %37 : vector<16x32xi32>
    %39 = arith.cmpi eq, %31, %38 : vector<16x32xi32>
    %cst_13 = arith.constant -1.000000e+00 : f32
    %cst_14 = arith.constant 0.000000e+00 : f32
    %40 = vector.broadcast %cst_13 : f32 to vector<16x32xf32>
    %41 = vector.broadcast %cst_14 : f32 to vector<16x32xf32>
    %42 = arith.select %39, %40, %41 : vector<16x32xi1>, vector<16x32xf32>
    %cst_15 = arith.constant 1.000000e+00 : f32
    %43 = vector.broadcast %cst_15 : f32 to vector<16x32xf32>
    %44 = arith.select %34, %43, %42 : vector<16x32xi1>, vector<16x32xf32>
    %45 = tpu.iota {dimensions = array<i32: 1>} : vector<1x32xi32>
    %c2_i32_16 = arith.constant 2 : i32
    %c0_i32 = arith.constant 0 : i32
    %46 = arith.cmpi eq, %c2_i32_16, %c0_i32 : i32
    %c1_i32_17 = arith.constant 1 : i32
    %47 = arith.select %46, %c1_i32_17, %c2_i32_16 : i32
    %48 = vector.broadcast %47 : i32 to vector<1x32xi32>
    %49 = arith.remsi %45, %48 : vector<1x32xi32>
    %c0_i32_18 = arith.constant 0 : i32
    %50 = vector.broadcast %c0_i32_18 : i32 to vector<1x32xi32>
    %51 = arith.cmpi ne, %49, %50 : vector<1x32xi32>
    %c0_i32_19 = arith.constant 0 : i32
    %52 = vector.broadcast %c0_i32_19 : i32 to vector<1x32xi32>
    %53 = arith.cmpi slt, %49, %52 : vector<1x32xi32>
    %c0_i32_20 = arith.constant 0 : i32
    %54 = arith.cmpi slt, %47, %c0_i32_20 : i32
    %55 = vector.broadcast %54 : i1 to vector<1x32xi1>
    %56 = vector.broadcast %55 : vector<1x32xi1> to vector<1x32xi1>
    %57 = arith.xori %53, %56 : vector<1x32xi1>
    %58 = arith.andi %57, %51 : vector<1x32xi1>
    %59 = vector.broadcast %47 : i32 to vector<1x32xi32>
    %60 = arith.addi %49, %59 : vector<1x32xi32>
    %61 = arith.select %58, %60, %49 : vector<1x32xi1>, vector<1x32xi32>
    %62 = arith.sitofp %61 : vector<1x32xi32> to vector<1x32xf32>
    %cst_21 = arith.constant dense<0.000000e+00> : vector<1x32xf32>
    %63 = tpu.matmul %1, %44, %cst_21 {dimension_numbers = #tpu.dot_dimension_numbers<[1], [0], [0], [1], [0, 0, 1, 1], [], []>} : vector<1x16xf32>, vector<16x32xf32>, vector<1x32xf32> -> vector<1x32xf32>
    %64 = arith.addf %62, %63 : vector<1x32xf32>
    %65 = arith.mulf %64, %29 : vector<1x32xf32>
    %66 = vector.shape_cast %65 : vector<1x32xf32> to vector<1x1x32xf32>
    %cst_22 = arith.constant dense<0.000000e+00> : vector<1xf32>
    %67 = vector.multi_reduction <add>, %66, %cst_22 [1, 2] : vector<1x1x32xf32> to vector<1xf32>
    %68 = vector.shape_cast %67 : vector<1xf32> to vector<1x1x1xf32>
    %69 = vector.extract %68[0, 0, 0] : f32 from vector<1x1x1xf32>
    %70 = vector.extract_strided_slice %28 {offsets = [0, 0], sizes = [1, 31], strides = [1, 1]} : vector<1x32xf32> to vector<1x31xf32>
    %71 = vector.extract_strided_slice %28 {offsets = [0, 1], sizes = [1, 31], strides = [1, 1]} : vector<1x32xf32> to vector<1x31xf32>
    %72 = arith.addf %70, %71 : vector<1x31xf32>
    %73 = tpu.reciprocal %72 : vector<1x31xf32> -> vector<1x31xf32>
    %74 = arith.mulf %70, %73 : vector<1x31xf32>
    %75 = math.log %72 : vector<1x31xf32>
    %76 = vector.extract_strided_slice %64 {offsets = [0, 0], sizes = [1, 31], strides = [1, 1]} : vector<1x32xf32> to vector<1x31xf32>
    %77 = arith.subf %76, %74 : vector<1x31xf32>
    %78 = math.absf %77 : vector<1x31xf32>
    %cst_23 = arith.constant 2.000000e+00 : f32
    %79 = vector.broadcast %cst_23 : f32 to vector<1x31xf32>
    %80 = arith.mulf %79, %73 : vector<1x31xf32>
    %cst_24 = arith.constant 1.000000e+00 : f32
    %81 = vector.broadcast %cst_24 : f32 to vector<1x31xf32>
    %82 = arith.addf %81, %80 : vector<1x31xf32>
    %83 = arith.mulf %78, %82 : vector<1x31xf32>
    %84 = tpu.iota {dimensions = array<i32: 1>} : vector<1x31xi32>
    %c2_i32_25 = arith.constant 2 : i32
    %c0_i32_26 = arith.constant 0 : i32
    %85 = arith.cmpi eq, %c2_i32_25, %c0_i32_26 : i32
    %c1_i32_27 = arith.constant 1 : i32
    %86 = arith.select %85, %c1_i32_27, %c2_i32_25 : i32
    %87 = vector.broadcast %86 : i32 to vector<1x31xi32>
    %88 = arith.remsi %84, %87 : vector<1x31xi32>
    %c0_i32_28 = arith.constant 0 : i32
    %89 = vector.broadcast %c0_i32_28 : i32 to vector<1x31xi32>
    %90 = arith.cmpi ne, %88, %89 : vector<1x31xi32>
    %c0_i32_29 = arith.constant 0 : i32
    %91 = vector.broadcast %c0_i32_29 : i32 to vector<1x31xi32>
    %92 = arith.cmpi slt, %88, %91 : vector<1x31xi32>
    %c0_i32_30 = arith.constant 0 : i32
    %93 = arith.cmpi slt, %86, %c0_i32_30 : i32
    %94 = vector.broadcast %93 : i1 to vector<1x31xi1>
    %95 = vector.broadcast %94 : vector<1x31xi1> to vector<1x31xi1>
    %96 = arith.xori %92, %95 : vector<1x31xi1>
    %97 = arith.andi %96, %90 : vector<1x31xi1>
    %98 = vector.broadcast %86 : i32 to vector<1x31xi32>
    %99 = arith.addi %88, %98 : vector<1x31xi32>
    %100 = arith.select %97, %99, %88 : vector<1x31xi1>, vector<1x31xi32>
    %c0_i32_31 = arith.constant 0 : i32
    %101 = vector.broadcast %c0_i32_31 : i32 to vector<1x31xi32>
    %102 = arith.cmpi eq, %100, %101 : vector<1x31xi32>
    %cst_32 = arith.constant 1.000000e-01 : f32
    %103 = vector.broadcast %cst_32 : f32 to vector<1x31xf32>
    %104 = arith.mulf %103, %83 : vector<1x31xf32>
    %105 = arith.addf %75, %104 : vector<1x31xf32>
    %cst_33 = arith.constant 0.000000e+00 : f32
    %106 = vector.broadcast %cst_33 : f32 to vector<1x31xf32>
    %107 = arith.select %102, %105, %106 : vector<1x31xi1>, vector<1x31xf32>
    %108 = vector.shape_cast %107 : vector<1x31xf32> to vector<1x1x31xf32>
    %cst_34 = arith.constant dense<0.000000e+00> : vector<1xf32>
    %109 = vector.multi_reduction <add>, %108, %cst_34 [1, 2] : vector<1x1x31xf32> to vector<1xf32>
    %110 = vector.shape_cast %109 : vector<1xf32> to vector<1x1x1xf32>
    %111 = vector.extract %110[0, 0, 0] : f32 from vector<1x1x1xf32>
    %112 = arith.subf %111, %69 : f32
    %113 = arith.addf %18, %112 : f32
    %114 = vector.extract_strided_slice %3 {offsets = [0, 1], sizes = [1, 15], strides = [1, 1]} : vector<1x16xf32> to vector<1x15xf32>
    %115 = vector.extract_strided_slice %3 {offsets = [0, 0], sizes = [1, 15], strides = [1, 1]} : vector<1x16xf32> to vector<1x15xf32>
    %116 = arith.subf %114, %115 : vector<1x15xf32>
    %117 = tpu.iota {dimensions = array<i32: 1>} : vector<1x15xi32>
    %c8_i32 = arith.constant 8 : i32
    %c0_i32_35 = arith.constant 0 : i32
    %118 = arith.cmpi eq, %c8_i32, %c0_i32_35 : i32
    %c1_i32_36 = arith.constant 1 : i32
    %119 = arith.select %118, %c1_i32_36, %c8_i32 : i32
    %120 = vector.broadcast %119 : i32 to vector<1x15xi32>
    %121 = arith.remsi %117, %120 : vector<1x15xi32>
    %c0_i32_37 = arith.constant 0 : i32
    %122 = vector.broadcast %c0_i32_37 : i32 to vector<1x15xi32>
    %123 = arith.cmpi ne, %121, %122 : vector<1x15xi32>
    %c0_i32_38 = arith.constant 0 : i32
    %124 = vector.broadcast %c0_i32_38 : i32 to vector<1x15xi32>
    %125 = arith.cmpi slt, %121, %124 : vector<1x15xi32>
    %c0_i32_39 = arith.constant 0 : i32
    %126 = arith.cmpi slt, %119, %c0_i32_39 : i32
    %127 = vector.broadcast %126 : i1 to vector<1x15xi1>
    %128 = vector.broadcast %127 : vector<1x15xi1> to vector<1x15xi1>
    %129 = arith.xori %125, %128 : vector<1x15xi1>
    %130 = arith.andi %129, %123 : vector<1x15xi1>
    %131 = vector.broadcast %119 : i32 to vector<1x15xi32>
    %132 = arith.addi %121, %131 : vector<1x15xi32>
    %133 = arith.select %130, %132, %121 : vector<1x15xi1>, vector<1x15xi32>
    %c7_i32 = arith.constant 7 : i32
    %134 = vector.broadcast %c7_i32 : i32 to vector<1x15xi32>
    %135 = arith.cmpi ne, %133, %134 : vector<1x15xi32>
    %136 = math.absf %116 : vector<1x15xf32>
    %cst_40 = arith.constant 0.000000e+00 : f32
    %137 = vector.broadcast %cst_40 : f32 to vector<1x15xf32>
    %138 = arith.select %135, %136, %137 : vector<1x15xi1>, vector<1x15xf32>
    %139 = vector.shape_cast %138 : vector<1x15xf32> to vector<1x1x15xf32>
    %cst_41 = arith.constant dense<0.000000e+00> : vector<1xf32>
    %140 = vector.multi_reduction <add>, %139, %cst_41 [1, 2] : vector<1x1x15xf32> to vector<1xf32>
    %141 = vector.shape_cast %140 : vector<1xf32> to vector<1x1x1xf32>
    %142 = vector.extract %141[0, 0, 0] : f32 from vector<1x1x1xf32>
    %143 = tpu.iota {dimensions = array<i32: 1>} : vector<1x8x128xi32>
    %144 = tpu.iota {dimensions = array<i32: 2>} : vector<1x8x128xi32>
    %c0_i32_42 = arith.constant 0 : i32
    %145 = vector.broadcast %c0_i32_42 : i32 to vector<1x8x128xi32>
    %146 = arith.cmpi eq, %143, %145 : vector<1x8x128xi32>
    %c0_i32_43 = arith.constant 0 : i32
    %147 = vector.broadcast %c0_i32_43 : i32 to vector<1x8x128xi32>
    %148 = arith.cmpi eq, %144, %147 : vector<1x8x128xi32>
    %149 = arith.andi %146, %148 : vector<1x8x128xi1>
    %cst_44 = arith.constant 0.000000e+00 : f32
    %150 = vector.broadcast %113 : f32 to vector<1x8x128xf32>
    %151 = vector.broadcast %cst_44 : f32 to vector<1x8x128xf32>
    %152 = arith.select %149, %150, %151 : vector<1x8x128xi1>, vector<1x8x128xf32>
    %c0_i32_45 = arith.constant 0 : i32
    %153 = vector.broadcast %c0_i32_45 : i32 to vector<1x8x128xi32>
    %154 = arith.cmpi eq, %143, %153 : vector<1x8x128xi32>
    %c1_i32_46 = arith.constant 1 : i32
    %155 = vector.broadcast %c1_i32_46 : i32 to vector<1x8x128xi32>
    %156 = arith.cmpi eq, %144, %155 : vector<1x8x128xi32>
    %157 = arith.andi %154, %156 : vector<1x8x128xi1>
    %158 = vector.broadcast %142 : f32 to vector<1x8x128xf32>
    %159 = arith.select %157, %158, %152 : vector<1x8x128xi1>, vector<1x8x128xf32>
    %c0_47 = arith.constant 0 : index
    %c0_48 = arith.constant 0 : index
    %c0_49 = arith.constant 0 : index
    %160 = vector.load %arg5[%c0_47, %c0_48, %c0_49] : memref<1x8x128xf32, #tpu.memory_space<vmem>>, vector<1x8x128xf32>
    tpu.vector_store %arg5[%c0_47, %c0_48, %c0_49], %159 {strides = array<i32>} : memref<1x8x128xf32, #tpu.memory_space<vmem>>, vector<1x8x128xf32>,
    return
  }
  func.func @transform_0(%arg0: i32) -> (i32, i32) {
    %c0_i32 = arith.constant 0 : i32
    %c0_i32_0 = arith.constant 0 : i32
    return %arg0, %c0_i32 : i32, i32
  }
  func.func @transform_1(%arg0: i32) -> (i32, i32) {
    %c0_i32 = arith.constant 0 : i32
    %c0_i32_0 = arith.constant 0 : i32
    return %arg0, %c0_i32 : i32, i32
  }
  func.func @transform_2(%arg0: i32) -> (i32, i32) {
    %c0_i32 = arith.constant 0 : i32
    %c0_i32_0 = arith.constant 0 : i32
    return %arg0, %c0_i32 : i32, i32
  }
  func.func @transform_3(%arg0: i32) -> (i32, i32) {
    %c0_i32 = arith.constant 0 : i32
    %c0_i32_0 = arith.constant 0 : i32
    return %arg0, %c0_i32 : i32, i32
  }
  func.func @transform_4(%arg0: i32) -> (i32, i32, i32) {
    %c0_i32 = arith.constant 0 : i32
    %c0_i32_0 = arith.constant 0 : i32
    %c0_i32_1 = arith.constant 0 : i32
    return %arg0, %c0_i32, %c0_i32_0 : i32, i32, i32
  }
}

</mosaic_0001>

<bundles_post_ra>
// kernel: master_loss.1
= control target key start
LH: loop header
LB: loop body
LE: loop exit
PB: predicated region body
PF: predicated region fallthrough
CT: control target
= control target key end

     0   :  { %v68_v0 = vlaneseq  ;;  %s255_s19 = smov 1   ;;  %v256_v13 = vmov 0.0   ;;  %vm98_vm4 = vcmask 130048   ;;  %vm124_vm6 = vcmask 253952   ;;  %s313_s1 = inlined_call_operand.vmem [shape: f32[1,16], index: 1, kind: input, shape index: {}]   ;;  %s314_s0 = inlined_call_operand.vmem [shape: f32[1,32], index: 0, kind: input, shape index: {}]   ;;  %s315_s3 = inlined_call_operand.vmem [shape: s32[1,16], index: 3, kind: input, shape index: {}]   ;;  %s316_s2 = inlined_call_operand.vmem [shape: f32[1,16], index: 2, kind: input, shape index: {}]   ;;  %s317_s4 = inlined_call_operand.vmem [shape: f32[1,8,128], index: 4, kind: output, shape index: {}]  }
   0x1   :  { %v20_v1 = vld [vmem:[%s313_s1] sm:$0x1]  ;;  %vm39_vm10 = vcmask 122880   ;;  %vm166_vm14 = vcmask 245760  }
   0x2   :  { %v21_v2 = vld [vmem:[%s314_s0] sm:$0x1]  ;;  %180 = vrot.lane.b32.xlu0 %v20_v1, %s255_s19  ;;  %v289_v4 = vshrl.u32 %v68_v0, 7  ;;  %v293_v8 = vand.u32 127, %v68_v0 }
   0x3   :  { %v51_v3 = vand.u32 2147483647, %v21_v2  ;;  %v17_v15 = vld [vmem:[%s315_s3] sm:$0x1]  ;;  %v50_v27 = vmax.f32 %v21_v2, 0.0  ;;  %s257_s3 = smov 127  }
   0x4   :  { %v70_v6 = vadd.s32 8, %v289_v4  ;;  %v73_v7 = vmul.u32 2, %v289_v4  ;;  %v18_v19 = vcvt.s32.f32 %v17_v15  ;;  %v19_v32 = vld [vmem:[%s316_s2] sm:$0x1]  ;;  %v89_v41 = vand.u32 1, %v293_v8 }
   0x5   :  { %v52_v5 = vsub.f32 0.0, %v51_v3  ;;  %v25_v35 = vand.u32 2147483647, %v19_v32  ;;  %v22_v56 = vmax.f32 %v19_v32, 0.0 }
   0x6   :  { %v74_v10 = vmul.u32 2, %v70_v6  ;;  %v77_v11 = vadd.s32 1, %v73_v7  ;;  %vm75_vm2 = vcmp.eq.s32.totalorder %v293_v8, %v73_v7  ;;  %v97_v43 = vcvt.s32.f32 %v89_v41 }
   0x7   :  { %v53_v9 = vmul.f32 1.442695, %v52_v5  ;;  %v26_v38 = vsub.f32 0.0, %v25_v35  ;;  %v23_v55 = vmul.f32 %v19_v32, %v18_v19  ;;  %vm162_vm13 = vcmp.eq.s32.totalorder %v89_v41, 0 }
   0x8   :  { %v78_v12 = vadd.s32 1, %v74_v10  ;;  %vm79_vm0 = vcmp.eq.s32.totalorder %v293_v8, %v77_v11  ;;  %vm76_vm1 = vcmp.eq.s32.totalorder %v293_v8, %v74_v10 }
   0x9   :  { %241 = vpow2.f32 %v53_v9  ;;  %v81_v14 = vsel %vm79_vm0, -1.0, %v256_v13  ;;  %v27_v39 = vmul.f32 1.442695, %v26_v38  ;;  %v24_v61 = vsub.f32 %v22_v56, %v23_v55 }
   0xa   :  { %vm80_vm3 = vcmp.eq.s32.totalorder %v293_v8, %v78_v12  ;;  %v83_v18 = vsel %vm75_vm2, 1.0, %v81_v14  ;;  %vm204_vm0 = vcmask 114688   ;;  %vm216_vm2 = vcmp.eq.s32.totalorder %v293_v8, 0 }
   0xb   :  { %v82_v16 = vsel %vm80_vm3, -1.0, %v256_v13  ;;  %vm220_vm3 = vcmp.eq.s32.totalorder %v293_v8, 1 }
   0xc   :  { %v84_v17 = vsel %vm76_vm1, 1.0, %v82_v16  ;;  %vm215_vm1 = vcmp.eq.s32.totalorder %v289_v4, 0 }
   0xd   :  { %116 = vmatpush.msra.mxu0 %v84_v17 }
   0xf   :  { %v242_v20 = vpop.eup %241  ;;  %117 = vmatpush.msra.mxu0 %v83_v18 }
  0x10   :  { %v55_v21 = vadd.f32 1.0, %v242_v20  ;;  %v58_v22 = vmul.f32 -0.5, %v242_v20  ;;  %229 = vmatmul.msk.f32.vlgmr.msra.gmra.mxu0 %vm98_vm4, %v18_v19  ;;  %v61_v24 = vand.u32 2147483647, %v242_v20  ;;  %vm217_vm4 = vmand %vm215_vm1, %vm216_vm2 }
  0x12   :  { %243 = vlog2.f32 %v55_v21  ;;  %v59_v23 = vadd.f32 1.0, %v58_v22  ;;  %vm62_vm5 = vcmp.lt.f32.partialorder %v61_v24, 0.0004427343  ;;  %v188_v24 = vand.u32 7, %v293_v8 }
  0x13   :  { %245 = vpow2.f32 %v27_v39 }
  0x14   :  { %v60_v25 = vmul.f32 %v242_v20, %v59_v23  ;;  %vm196_vm15 = vcmp.ne.s32.totalorder %v188_v24, 7 }
  0x18   :  { %v244_v26 = vpop.eup %243 }
  0x19   :  { %v57_v28 = vmul.f32 0.6931472, %v244_v26  ;;  %v246_v40 = vpop.eup %245 }
  0x1a   :  { %v29_v42 = vadd.f32 1.0, %v246_v40  ;;  %v32_v45 = vmul.f32 -0.5, %v246_v40  ;;  %v35_v53 = vand.u32 2147483647, %v246_v40 }
  0x1b   :  { %v63_v29 = vsel %vm62_vm5, %v60_v25, %v57_v28  ;;  %vm221_vm5 = vmand %vm215_vm1, %vm220_vm3 }
  0x1c   :  { %v64_v30 = vadd.f32 %v63_v29, %v50_v27  ;;  %v33_v51 = vadd.f32 1.0, %v32_v45  ;;  %vm36_vm7 = vcmp.lt.f32.partialorder %v35_v53, 0.0004427343 }
  0x1e   :  { %v65_v31 = vadd.f32 1.0, %v64_v30  ;;  %v34_v59 = vmul.f32 %v246_v40, %v33_v51 }
  0x20   :  { %136 = vrot.lane.b32.xlu0 %v65_v31, %s257_s3  ;;  %247 = vlog2.f32 %v65_v31 }
  0x21   :  { %249 = vlog2.f32 %v29_v42 }
  0x26   :  { %v248_v46 = vpop.eup %247 }
  0x27   :  { %v67_v50 = vmul.f32 0.6931472, %v248_v46  ;;  %v250_v52 = vpop.eup %249 }
  0x28   :  { %v31_v58 = vmul.f32 0.6931472, %v250_v52 }
  0x2a   :  { %v37_v63 = vsel %vm36_vm7, %v34_v59, %v31_v58 }
  0x2b   :  { %v38_v3 = vadd.f32 %v37_v63, %v24_v61 }
  0x2d   :  { %v40_v9 = vsel %vm39_vm10, %v38_v3, 0.0 }
  0x74   :  { %v181_v33 = vpop.permute.xlu0 %180 }
  0x75   :  { %v183_v34 = vsub.f32 %v20_v1, %v181_v33 }
  0x77   :  { %v197_v36 = vand.u32 2147483647, %v183_v34 }
  0x79   :  { %v199_v37 = vperm.slane %v197_v36, 0 }
  0x7b   :  { %200 = vrot.lane.b32.xlu1 %v199_v37, %s257_s3 }
  0x8d   :  { %v119_v44 = vpop.f32.mrf.mxu0 }
  0x8e   :  { %v122_v48 = vadd.f32 %v119_v44, %v97_v43 }
  0x90   :  { %v123_v54 = vmul.f32 %v122_v48, %v67_v50 }
  0x92   :  { %v137_v47 = vpop.permute.xlu0 %136  ;;  %v125_v57 = vsel %vm124_vm6, %v123_v54, 0.0 }
  0x93   :  { %v139_v49 = vadd.f32 %v137_v47, %v65_v31  ;;  %126 = vadd.xlane.f32.xlu2 %v125_v57 }
  0x95   :  { %251 = vrcp.f32 %v139_v49  ;;  %v151_v0 = vand.u32 2147483648, %v139_v49  ;;  %vm145_vm8 = vweird.f32 %v139_v49  ;;  %v149_v2 = vand.u32 2147483647, %v139_v49 }
  0x96   :  { %253 = vlog2.f32 %v139_v49 }
  0x97   :  { %v152_v6 = vor.u32 1.1754944e-38, %v151_v0  ;;  %vm150_vm12 = vcmp.eq.f32.partialorder %v149_v2, 8.507059e+37 }
  0x9b   :  { %v252_v60 = vpop.eup %251 }
  0x9c   :  { %v141_v62 = vmul.f32 %v252_v60, %v139_v49  ;;  %vm146_vm9 = vweird.f32 %v252_v60  ;;  %v254_v16 = vpop.eup %253 }
  0x9d   :  { %vm147_vm11 = vmor %vm145_vm8, %vm146_vm9  ;;  %v156_v19 = vmul.f32 0.6931472, %v254_v16 }
  0x9e   :  { %v142_v1 = vsub.f32 1.0, %v141_v62 }
  0xa0   :  { %v143_v5 = vmul.f32 %v252_v60, %v142_v1 }
  0xa2   :  { %v144_v7 = vadd.f32 %v252_v60, %v143_v5 }
  0xa4   :  { %v148_v10 = vsel %vm147_vm11, %v252_v60, %v144_v7 }
  0xa5   :  { %v153_v11 = vsel %vm150_vm12, %v152_v6, %v148_v10  ;;  %41 = vadd.xlane.f32.xlu1 %v40_v9 }
  0xa6   :  { %v154_v12 = vmul.f32 %v153_v11, %v65_v31  ;;  %v159_v13 = vmul.f32 2.0, %v153_v11 }
  0xa8   :  { %v157_v14 = vsub.f32 %v122_v48, %v154_v12  ;;  %v160_v15 = vadd.f32 1.0, %v159_v13 }
  0xaa   :  { %v158_v17 = vand.u32 2147483647, %v157_v14 }
  0xac   :  { %v161_v18 = vmul.f32 %v160_v15, %v158_v17 }
  0xae   :  { %v163_v20 = vmul.f32 0.1, %v161_v18 }
  0xb0   :  { %v164_v21 = vadd.f32 %v163_v20, %v156_v19 }
  0xb2   :  { %v165_v22 = vsel %vm162_vm13, %v164_v21, 0.0 }
  0xb3   :  { %v167_v23 = vsel %vm166_vm14, %v165_v22, 0.0 }
  0xb4   :  { %168 = vadd.xlane.f32.xlu2 %v167_v23 }
  0xed   :  { %v201_v25 = vpop.permute.xlu1 %200 }
  0xee   :  { %v203_v26 = vsel %vm196_vm15, %v201_v25, 0.0 }
  0xef   :  { %v205_v27 = vsel %vm204_vm0, %v203_v26, 0.0 }
  0xf0   :  { %206 = vadd.xlane.f32.xlu0 %v205_v27 }
 0x106   :  { %v127_v28 = vpop.xlane.xlu2 %126 }
 0x107   :  { %v128_v29 = vrot.slane %v127_v28, 4 }
 0x109   :  { %v129_v30 = vadd.f32 %v128_v29, %v127_v28 }
 0x10b   :  { %v130_v31 = vrot.slane %v129_v30, 2 }
 0x10d   :  { %v131_v34 = vadd.f32 %v130_v31, %v129_v30 }
 0x10f   :  { %v132_v37 = vrot.slane %v131_v34, 1 }
 0x111   :  { %v133_v40 = vadd.f32 %v132_v37, %v131_v34 }
 0x118   :  { %v42_v32 = vpop.xlane.xlu1 %41 }
 0x119   :  { %v43_v33 = vrot.slane %v42_v32, 4 }
 0x11b   :  { %v44_v35 = vadd.f32 %v43_v33, %v42_v32 }
 0x11d   :  { %v45_v36 = vrot.slane %v44_v35, 2 }
 0x11f   :  { %v46_v38 = vadd.f32 %v45_v36, %v44_v35 }
 0x121   :  { %v47_v39 = vrot.slane %v46_v38, 1 }
 0x123   :  { %v48_v41 = vadd.f32 %v47_v39, %v46_v38 }
 0x125   :  { %230 = vpush %v48_v41 }
 0x126   :  { %232 = vpush %v133_v40 }
 0x127   :  { %v169_v42 = vpop.xlane.xlu2 %168 }
 0x128   :  { %v170_v43 = vrot.slane %v169_v42, 4 }
 0x12a   :  { %v171_v44 = vadd.f32 %v170_v43, %v169_v42 }
 0x12c   :  { %v172_v45 = vrot.slane %v171_v44, 2 }
 0x12e   :  { %v173_v46 = vadd.f32 %v172_v45, %v171_v44 }
 0x130   :  { %v174_v47 = vrot.slane %v173_v46, 1 }
 0x132   :  { %v175_v48 = vadd.f32 %v174_v47, %v173_v46 }
 0x134   :  { %234 = vpush %v175_v48 }
 0x156   :  { %s231_s2 = spop %230 }
 0x157   :  { %s233_s22 = spop %232 }
 0x163   :  { %v207_v49 = vpop.xlane.xlu0 %206 }
 0x164   :  { %v208_v50 = vrot.slane %v207_v49, 4 }
 0x165   :  { %s235_s23 = spop %234 }
 0x166   :  { %v209_v51 = vadd.f32 %v208_v50, %v207_v49  ;;  %s177_s24 = ssub.f32 %s235_s23, %s233_s22 }
 0x168   :  { %v210_v52 = vrot.slane %v209_v51, 2  ;;  %s178_s25 = sadd.f32 %s231_s2, %s177_s24 }
 0x16a   :  { %v211_v53 = vadd.f32 %v210_v52, %v209_v51  ;;  %v218_v56 = vstv %s178_s25 }
 0x16b   :  { %v219_v57 = vsel %vm217_vm4, %v218_v56, 0.0 }
 0x16c   :  { %v212_v54 = vrot.slane %v211_v53, 1 }
 0x16e   :  { %v213_v55 = vadd.f32 %v212_v54, %v211_v53 }
 0x170   :  { %236 = vpush %v213_v55 }
 0x1a1   :  { %s237_s26 = spop %236 }
 0x1a2   :  { %v222_v58 = vstv %s237_s26 }
 0x1a3   :  { %v223_v59 = vsel %vm221_vm5, %v222_v58, %v219_v57 }
 0x1a4   :  { %224 = vst [vmem:[%s317_s4] sm:$0xff] %v223_v59 }

</bundles_post_ra>
